<compile_context>
chip_gen: v7x
topology: tpu7x:2x2x1
jax: 0.10.0
libtpu: 0.0.40
codegen_flags: <defaults>
</compile_context>

<pallas_src>
import jax
import jax.numpy as jnp
from jax.experimental import pallas as pl
from jax.experimental.pallas import tpu as pltpu


def bn_relu_conv1_kernel(x_ref, scale_ref, bias_ref, w_ref, o_ref):
    # x_ref:     (1, C_in, ts)  spatial tile of one batch element (lanes = spatial)
    # scale_ref: (C_in, 1)      folded BN scale  (gamma / sqrt(var + eps))
    # bias_ref:  (C_in, 1)      folded BN bias   (beta - mean * scale)
    # w_ref:     (C_out, C_in)  1x1x1 conv weight
    # o_ref:     (1, C_out, ts)
    h = jnp.maximum(x_ref[0] * scale_ref[...] + bias_ref[...], 0.0)          # (C_in, ts)
    o_ref[0] = jnp.dot(
        w_ref[...], h, preferred_element_type=jnp.float32
    ).astype(o_ref.dtype)


def _pick_spatial_tile(s_pad, c_in, c_out, itemsize, vmem_budget_bytes):
    """Largest lane-dense (multiple-of-128) spatial tile whose double-buffered
    input + output tiles fit in the given VMEM budget."""
    per_elem = 2 * (c_in + c_out) * itemsize          # double-buffered in + out, bytes/elem
    ts = vmem_budget_bytes // max(per_elem, 1)
    ts = min(ts, s_pad, 65536)                        # keep vreg pressure sane
    ts = max(128, (ts // 128) * 128)
    return ts


def conv3d_block_forward(x, gamma, beta, weight, *, eps=1e-5,
                         vmem_tile_budget_bytes=16 << 20):
    """Forward of Conv3d_Block(num_in=C_in, num_out=C_out, norm='bn').

    x:      (N, C_in, D, H, W) float32
    gamma:  (C_in,)  BN weight
    beta:   (C_in,)  BN bias
    weight: (C_out, C_in, 1, 1, 1)  conv weight (bias=False)
    returns (N, C_out, D, H, W)
    """
    N, C_in, D, H, W = x.shape
    C_out = weight.shape[0]
    S = D * H * W

    # Free reshape: NCDHW is contiguous in (N, C, D*H*W).
    x3 = x.reshape(N, C_in, S)

    # --- BatchNorm training-mode statistics: single pass (sum & sum-of-squares), f32 acc.
    count = jnp.float32(N * S)
    xf = x3.astype(jnp.float32)
    s1 = jnp.sum(xf, axis=(0, 2))
    s2 = jnp.sum(xf * xf, axis=(0, 2))
    mean = s1 / count
    var = jnp.maximum(s2 / count - mean * mean, 0.0)                  # biased variance
    scale = gamma.astype(jnp.float32) / jnp.sqrt(var + eps)           # (C_in,)
    bias = beta.astype(jnp.float32) - mean * scale                    # (C_in,)

    # --- Spatial tiling: lane dim = flattened D*H*W, sized against a VMEM budget.
    itemsize = jnp.dtype(x.dtype).itemsize
    s_pad128 = pl.cdiv(S, 128) * 128
    ts = _pick_spatial_tile(s_pad128, C_in, C_out, itemsize, vmem_tile_budget_bytes)
    grid_s = pl.cdiv(S, ts)
    S_pad = grid_s * ts
    if S_pad != S:
        x3 = jnp.pad(x3, ((0, 0), (0, 0), (0, S_pad - S)))

    w2d = weight.reshape(C_out, C_in).astype(x.dtype)                 # (C_out, C_in)
    scale2 = scale.reshape(C_in, 1).astype(x.dtype)
    bias2 = bias.reshape(C_in, 1).astype(x.dtype)

    out3 = pl.pallas_call(
        bn_relu_conv1_kernel,
        out_shape=jax.ShapeDtypeStruct((N, C_out, S_pad), x.dtype),
        grid_spec=pl.GridSpec(
            grid=(N, grid_s),
            in_specs=[
                pl.BlockSpec((1, C_in, ts), lambda n, s: (n, 0, s)),   # x tile
                pl.BlockSpec((C_in, 1), lambda n, s: (0, 0)),          # folded BN scale
                pl.BlockSpec((C_in, 1), lambda n, s: (0, 0)),          # folded BN bias
                pl.BlockSpec((C_out, C_in), lambda n, s: (0, 0)),      # conv weight (resident)
            ],
            out_specs=pl.BlockSpec((1, C_out, ts), lambda n, s: (n, 0, s)),
        ),
        compiler_params=pltpu.CompilerParams(
            dimension_semantics=("parallel", "parallel"),
            vmem_limit_bytes=32 << 20,     # within v7x's 64 MiB physical, raises v5e default
        ),
    )(x3, scale2, bias2, w2d)

    if S_pad != S:
        out3 = out3[:, :, :S]
    return out3.reshape(N, C_out, D, H, W)


def reference_forward(x, gamma, beta, weight, eps=1e-5):
    mean = jnp.mean(x, axis=(0, 2, 3, 4), keepdims=True)
    var = jnp.mean((x - mean) ** 2, axis=(0, 2, 3, 4), keepdims=True)
    h = (x - mean) / jnp.sqrt(var + eps)
    h = h * gamma[None, :, None, None, None] + beta[None, :, None, None, None]
    h = jnp.maximum(h, 0.0)
    w2d = weight.reshape(weight.shape[0], weight.shape[1])            # (C_out, C_in)
    return jnp.einsum("ncdhw,oc->nodhw", h, w2d)


if __name__ == "__main__":
    key = jax.random.PRNGKey(0)
    k1, k2, k3, k4 = jax.random.split(key, 4)

    N, C_in, C_out = 2, 4, 8
    D = H = W = 8  # S = 512

    x = jax.random.normal(k1, (N, C_in, D, H, W), dtype=jnp.float32)
    gamma = 1.0 + 0.1 * jax.random.normal(k2, (C_in,), dtype=jnp.float32)
    beta = 0.1 * jax.random.normal(k3, (C_in,), dtype=jnp.float32)
    weight = jax.random.normal(k4, (C_out, C_in, 1, 1, 1), dtype=jnp.float32) * 0.1

    out = conv3d_block_forward(x, gamma, beta, weight)
    out = jax.block_until_ready(out)

    ref = reference_forward(x, gamma, beta, weight)
    assert out.shape == (N, C_out, D, H, W)
    assert jnp.allclose(out, ref, atol=1e-3, rtol=1e-3), "mismatch vs reference"

    print("KERNEL_OK")
</pallas_src>

<mosaic_0001>
module attributes {stable_mosaic.version = 11 : i64} {
  func.func @bn_relu_conv1_kernel(%arg0: i32, %arg1: i32, %arg2: memref<1x4x512xf32, #tpu.memory_space<vmem>>, %arg3: memref<4x1xf32, #tpu.memory_space<vmem>>, %arg4: memref<4x1xf32, #tpu.memory_space<vmem>>, %arg5: memref<8x4xf32, #tpu.memory_space<vmem>>, %arg6: memref<1x8x512xf32, #tpu.memory_space<vmem>>) attributes {dimension_semantics = [#tpu.dimension_semantics<parallel>, #tpu.dimension_semantics<parallel>], iteration_bounds = array<i64: 2, 1>, scalar_prefetch = 0 : i64, scratch_operands = 0 : i64, tpu.core_type = #tpu.core_type<tc>, window_params = [{transform_indices = @transform_0, window_bounds = array<i64: 1, 4, 512>}, {pipeline_mode = #tpu.pipeline_mode<synchronous>, transform_indices = @transform_1, window_bounds = array<i64: 4, 1>}, {pipeline_mode = #tpu.pipeline_mode<synchronous>, transform_indices = @transform_2, window_bounds = array<i64: 4, 1>}, {pipeline_mode = #tpu.pipeline_mode<synchronous>, transform_indices = @transform_3, window_bounds = array<i64: 8, 4>}, {transform_indices = @transform_4, window_bounds = array<i64: 1, 8, 512>}]} {
    %c0 = arith.constant 0 : index
    %c0_0 = arith.constant 0 : index
    %c0_1 = arith.constant 0 : index
    %0 = vector.load %arg2[%c0, %c0_0, %c0_1] : memref<1x4x512xf32, #tpu.memory_space<vmem>>, vector<1x4x512xf32>
    %1 = vector.shape_cast %0 : vector<1x4x512xf32> to vector<4x512xf32>
    %c0_2 = arith.constant 0 : index
    %c0_3 = arith.constant 0 : index
    %2 = vector.load %arg3[%c0_2, %c0_3] : memref<4x1xf32, #tpu.memory_space<vmem>>, vector<4x1xf32>
    %3 = vector.broadcast %2 : vector<4x1xf32> to vector<4x512xf32>
    %4 = arith.mulf %1, %3 : vector<4x512xf32>
    %c0_4 = arith.constant 0 : index
    %c0_5 = arith.constant 0 : index
    %5 = vector.load %arg4[%c0_4, %c0_5] : memref<4x1xf32, #tpu.memory_space<vmem>>, vector<4x1xf32>
    %6 = vector.broadcast %5 : vector<4x1xf32> to vector<4x512xf32>
    %7 = arith.addf %4, %6 : vector<4x512xf32>
    %cst = arith.constant 0.000000e+00 : f32
    %8 = vector.broadcast %cst : f32 to vector<4x512xf32>
    %9 = arith.maximumf %7, %8 : vector<4x512xf32>
    %c0_6 = arith.constant 0 : index
    %c0_7 = arith.constant 0 : index
    %10 = vector.load %arg5[%c0_6, %c0_7] : memref<8x4xf32, #tpu.memory_space<vmem>>, vector<8x4xf32>
    %cst_8 = arith.constant dense<0.000000e+00> : vector<8x512xf32>
    %11 = tpu.matmul %10, %9, %cst_8 {dimension_numbers = #tpu.dot_dimension_numbers<[1], [0], [0], [1], [0, 0, 1, 1], [], []>} : vector<8x4xf32>, vector<4x512xf32>, vector<8x512xf32> -> vector<8x512xf32>
    %c0_9 = arith.constant 0 : index
    %c0_10 = arith.constant 0 : index
    %c0_11 = arith.constant 0 : index
    %12 = vector.load %arg6[%c0_9, %c0_10, %c0_11] : memref<1x8x512xf32, #tpu.memory_space<vmem>>, vector<1x8x512xf32>
    %13 = vector.shape_cast %12 : vector<1x8x512xf32> to vector<8x512xf32>
    %14 = vector.shape_cast %11 : vector<8x512xf32> to vector<1x8x512xf32>
    tpu.vector_store %arg6[%c0_9, %c0_10, %c0_11], %14 {strides = array<i32>} : memref<1x8x512xf32, #tpu.memory_space<vmem>>, vector<1x8x512xf32>,
    return
  }
  func.func @transform_0(%arg0: i32, %arg1: i32) -> (i32, i32, i32) {
    %c0_i32 = arith.constant 0 : i32
    %c0_i32_0 = arith.constant 0 : i32
    return %arg0, %c0_i32, %arg1 : i32, i32, i32
  }
  func.func @transform_1(%arg0: i32, %arg1: i32) -> (i32, i32) {
    %c0_i32 = arith.constant 0 : i32
    %c0_i32_0 = arith.constant 0 : i32
    %c0_i32_1 = arith.constant 0 : i32
    return %c0_i32, %c0_i32_0 : i32, i32
  }
  func.func @transform_2(%arg0: i32, %arg1: i32) -> (i32, i32) {
    %c0_i32 = arith.constant 0 : i32
    %c0_i32_0 = arith.constant 0 : i32
    %c0_i32_1 = arith.constant 0 : i32
    return %c0_i32, %c0_i32_0 : i32, i32
  }
  func.func @transform_3(%arg0: i32, %arg1: i32) -> (i32, i32) {
    %c0_i32 = arith.constant 0 : i32
    %c0_i32_0 = arith.constant 0 : i32
    %c0_i32_1 = arith.constant 0 : i32
    return %c0_i32, %c0_i32_0 : i32, i32
  }
  func.func @transform_4(%arg0: i32, %arg1: i32) -> (i32, i32, i32) {
    %c0_i32 = arith.constant 0 : i32
    %c0_i32_0 = arith.constant 0 : i32
    return %arg0, %c0_i32, %arg1 : i32, i32, i32
  }
}

</mosaic_0001>

<bundles_post_ra>
// kernel: tpu_custom_call.1
= control target key start
LH: loop header
LB: loop body
LE: loop exit
PB: predicated region body
PF: predicated region fallthrough
CT: control target
= control target key end

     0   :  { %9 = vsyncpa [#allocation3], 0  ;;  %s948_s0 = inlined_call_operand.hbm [shape: f32[2,4,512], index: 0, kind: input, shape index: {}]   ;;  %s949_s1 = inlined_call_operand.vmem [shape: f32[4,1], index: 1, kind: input, shape index: {}]   ;;  %s950_s2 = inlined_call_operand.vmem [shape: f32[4,1], index: 2, kind: input, shape index: {}]   ;;  %s951_s3 = inlined_call_operand.vmem [shape: f32[8,4], index: 3, kind: input, shape index: {}]   ;;  %s952_s4 = inlined_call_operand.hbm [shape: f32[2,8,512], index: 4, kind: output, shape index: {}]  }
   0x1   :  { %11 = vsyncpa [#allocation3 + $0x1], 0 }
   0x2   :  { %12 = vsyncpa [#allocation4], 0 }
   0x3   :  { %14 = vsyncpa [#allocation4 + $0x1], 0  ;;  %s766_s15 = smov 0   ;;  %s768_s16 = smov 0  }
   0x4   :  { %s770_s17 = smov 0   ;;  %s772_s18 = smov 0  }
   0x5   :  { %s774_s19 = smov 0   ;;  %s776_s20 = smov 0  }
   0x6 LB: > { %s533_s21 = sadd.s32 4294967295, %s734_s20   ;;  %s534_s22 = sadd.s32 4294967294, %s734_s20   ;;  %s734_s20 = sphi %s776_s20, %s20_s20   ;;  %s730_s19 = sphi %s774_s19, %s968_s19   ;;  %s726_s18 = sphi %s772_s18, %s967_s18   ;;  %s722_s17 = sphi %s770_s17, %s966_s17   ;;  %s718_s16 = sphi %s768_s16, %s965_s16   ;;  %s714_s15 = sphi %s766_s15, %s964_s15  }
   0x7   : > { %s32_s23 = sadd.s32 1, %s730_s19  ;;  %s41_s24 = sadd.s32 1, %s722_s17 }
   0x8   : > { %p34_p0 = scmp.ge.s32.totalorder %s32_s23, 2  ;;  %p48_p1 = scmp.ne.s32.totalorder %s722_s17, %s718_s16 }
   0x9   : > { %p49_p2 = scmp.eq.s32.totalorder %s734_s20, 0  ;;  %p54_p3 = scmp.ne.s32.totalorder %s718_s16, %s714_s15 }
   0xa   : > { %s970_s23 = smov (%p34_p0, %s32_s23), 0  ;;  %p55_p5 = scmp.eq.s32.totalorder %s533_s21, 0 }
   0xb   : > { %p807_p4 = por %p49_p2, %p48_p1  ;;  %s36_s26 = ssub.s32 %s730_s19, %s970_s23 }
   0xc   : > { %p143_p6 = scmp.eq.s32.totalorder %s533_s21, 1  ;;  %p39_p7 = scmp.eq.s32.totalorder %s36_s26, 0 }
   0xd   : > { %p813_p8 = por %p55_p5, %p54_p3  ;;  %p149_p10 = scmp.eq.s32.totalorder %s534_s22, 1 }
   0xe   : > { %p817_p9 = por %p143_p6, %p48_p1  ;;  %p568_p13 = scmp.lt.s32.totalorder %s734_s20, 2 }
   0xf   : > { %s822_s29 = scalar_select %p39_p7, %s722_s17, %s41_s24  }
  0x10   : > { %s956_s28 = scalar_select %p817_p9, 1, 0 }
  0x11   : > { %p824_p11 = por %p149_p10, %p54_p3  ;;  %s178_s5 = sand.u32 1, %s722_s17  }
  0x12   : > { %s537_s6 = sshll.u32 %s178_s5, 4  ;;  %s554_s7 = sshll.u32 %s730_s19, 8 }
  0x13   : > { %s957_s30 = scalar_select %p824_p11, 1, 0 }
  0x14   : > { %s835_s10 = scalar_lea.hbm %s948_s0, %s554_s7  ;;  %s182_s11 = scalar_lea.vmem [#allocation2], %s537_s6 }
  0x15   : > { %s192_s12 = sshll.u32 %s182_s11, 4  ;;  %p841_p0 = pnand %p568_p13, %p807_p4  ;;  %s837_s12 = int_to_ptr.vmem [resolvable:$true] %s192_s12 }
  0x16   : > { %s179_s14 = scalar_lea.sflag [#allocation3], %s178_s5  ;;  %s622_s21 = scalar_lea.hbm %s835_s10, 256 }
  0x17   : > { %p623_p3 = scmp.ne.s32.totalorder %s835_s10, %s622_s21  ;;  %p624_p5 = pneg %p841_p0 }
  0x18   : > { %s627_s25 = scalar_lea.hbm %s948_s0, 512  ;;  %p628_p4 = scmp.lt.u32.totalorder %s835_s10, %s948_s0 }
  0x19   : > { %p625_p6 = pnand %p624_p5, %p623_p3  ;;  %p629_p10 = scmp.lt.u32.totalorder %s627_s25, %s622_s21 }
  0x1a   : > { %p631_p12 = scmp.lt.u32.totalorder %s622_s21, %s835_s10 }
  0x1b   : > { %p626_p7 = pneg %p625_p6  ;;  %p630_p13 = por %p629_p10, %p628_p4 }
  0x1d   : > { %p632_p1 = por %p631_p12, %p630_p13 }
  0x1f   : > { %p633_p2 = pnand %p632_p1, %p626_p7 }
  0x21   : > { %636 = shalt.err (!%p633_p2)
}
  0x22   : > { %s637_s5 = scalar_lea.vmem %s837_s12, 256  ;;  %s736_s7 = smov [#allocation2]  }
  0x23   : > { %p638_p3 = scmp.ne.s32.totalorder %s837_s12, %s637_s5  ;;  %s642_s8 = sshll.u32 %s736_s7, 4  ;;  %s643_s8 = int_to_ptr.vmem [resolvable:$false] %s642_s8 }
  0x24   : > { %s644_s9 = scalar_lea.vmem %s643_s8, 512  ;;  %p645_p9 = scmp.lt.s32.totalorder %s837_s12, %s643_s8 }
  0x25   : > { %p640_p6 = pnand %p638_p3, %p624_p5  ;;  %p646_p4 = scmp.lt.s32.totalorder %s644_s9, %s637_s5 }
  0x27   : > { %p641_p11 = pneg %p640_p6  ;;  %p647_p10 = por %p646_p4, %p645_p9 }
  0x29   : > { %p648_p12 = pnand %p647_p10, %p641_p11 }
  0x2b   : > { %651 = shalt.err (!%p648_p12)
}
  0x2c   : > { %563 = dma.hbm_to_vmem [thread:$0]  (!%p841_p0), %s835_s10, 256, %s837_s12, %s179_s14  }
  0x2d   : > { %p959_p1 = scmp.lt.s32.totalorder %s734_s20, 3  ;;  %p960_p2 = scmp.ge.s32.totalorder %s734_s20, 1 }
  0x2f   : > { %p198_p5 = pnand %p960_p2, %p959_p1 }
  0x30   : > { %s877_s11 = sand.u32 (!%p198_p5), 1, %s718_s16  }
  0x31   : > { %201 = sbr.rel (%p198_p5) target bundleno = 428 (0x1ac), region = 36  ;;  %s541_s21 = sshll.u32 (!%p198_p5), %s877_s11, 4 }
  0x32   : > { %s204_s22 = scalar_lea.sflag (!%p198_p5), [#allocation3], %s877_s11  ;;  %s207_s24 = scalar_lea.vmem (!%p198_p5), [#allocation2], %s541_s21 }
  0x38   : > { %705 = dma.done.wait (%p813_p8), %s204_s22, 256  }
  0x39   : > { %707 = vsyncadd (%p813_p8), %s204_s22, 4294967040  ;;  %v737_v0 = vmov 0   ;;  %v236_v1 = vld [vmem:[%s949_s1] sm:$0xf]  ;;  %v738_v3 = vmov 0.0   ;;  %v244_v6 = vlaneseq  ;;  %v235_v13 = vld [vmem:[%s207_s24 + $0x8] sm:$0xff] }
  0x3a   : > { %621 = vset.pattern.permute.xlu0 %v737_v0  ;;  %v251_v2 = vld [vmem:[%s950_s2] sm:$0xf]  ;;  %350 = vmatprep.mubr.f32.mxu0 %v738_v3  ;;  %v739_v4 = vmov 839922192   ;;  %vm277_vm0 = vcmask 1043456   ;;  %vm273_vm1 = vcmask 31744  }
  0x3b   : > { %239 = vperm.xlu0 %621, %v236_v1   ;;  %421 = vmatprep.mubr.f32.mxu1 %v738_v3  ;;  %v242_v5 = vunpack.c.l.s4 %v739_v4  ;;  %v245_v8 = vshrl.u32 %v244_v6, 7  ;;  %v234_v12 = vld [vmem:[%s207_s24] sm:$0xff]  ;;  %s542_s26 = sshll.u32 %s877_s11, 5  ;;  %s555_s7 = sshll.u32 %s726_s18, 9 }
  0x3c   : > { %v268_v24 = vld [vmem:[%s951_s3] sm:$0xff]  ;;  %s231_s6 = scalar_lea.vmem [#allocation5], %s542_s26  ;;  %s901_s21 = scalar_lea.hbm %s952_s4, %s555_s7 }
  0x3d   : > { %v243_v7 = vunpack.c.0.s8 %v242_v5  ;;  %s449_s5 = sshll.u32 %s231_s6, 4  ;;  %s433_s22 = scalar_lea.sflag [#allocation4], %s877_s11  ;;  %s896_s5 = int_to_ptr.vmem [resolvable:$true] %s449_s5 }
  0x3e   : > { %s652_s18 = scalar_lea.vmem %s896_s5, 512  ;;  %p961_p9 = scmp.ne.s32.totalorder %s956_s28, 0 }
  0x3f   : > { %254 = vperm.xlu0 %621, %v251_v2   ;;  %v246_v9 = vsub.s32 %v243_v7, %v245_v8  ;;  %p653_p8 = scmp.ne.s32.totalorder %s896_s5, %s652_s18  ;;  %s740_s24 = smov [#allocation5]  }
  0x40   : > { %s656_s10 = sshll.u32 %s740_s24, 4  ;;  %s657_s10 = int_to_ptr.vmem [resolvable:$false] %s656_s10 }
  0x41   : > { %p654_p11 = pnand %p653_p8, %p961_p9  ;;  %s658_s12 = scalar_lea.vmem %s657_s10, 1024 }
  0x42   : > { %p659_p7 = scmp.lt.s32.totalorder %s896_s5, %s657_s10  ;;  %p660_p13 = scmp.lt.s32.totalorder %s658_s12, %s652_s18 }
  0x43   : > { %p655_p0 = pneg %p654_p11 }
  0x44   : > { %p661_p3 = por %p660_p13, %p659_p7 }
  0x46   : > { %p662_p6 = pnand %p661_p3, %p655_p0 }
  0xba   : > { %v240_v10 = vpop.permute.xlu0 %239 }
  0xbb   : > { %v247_v11 = vrot.slane %v240_v10, %v246_v9 }
  0xbd   : > { %v249_v15 = vmul.f32 %v247_v11, %v234_v12  ;;  %v250_v16 = vmul.f32 %v247_v11, %v235_v13 }
  0xbe   : > { %v255_v14 = vpop.permute.xlu0 %254 }
  0xbf   : > { %v262_v17 = vrot.slane %v255_v14, %v246_v9 }
  0xc1   : > { %v264_v18 = vadd.f32 %v262_v17, %v249_v15  ;;  %v265_v19 = vadd.f32 %v262_v17, %v250_v16 }
  0xc3   : > { %v266_v20 = vmax.f32 %v264_v18, 0.0  ;;  %v267_v21 = vmax.f32 %v265_v19, 0.0 }
  0xc5   : > { %v271_v22 = vcombine.high %v266_v20, %v266_v20  ;;  %v272_v23 = vcombine.high %v267_v21, %v267_v21 }
  0xc7   : > { %543 = vmatprep.subr.msk.mxu0 %vm277_vm0, %v271_v22  ;;  %546 = vmatprep.subr.msk.mxu1 %vm277_vm0, %v272_v23 }
  0xc8   : > { %544 = vmatpush1.msk.msra.mxu0 %vm277_vm0, %v266_v20  ;;  %547 = vmatpush1.msk.msra.mxu1 %vm277_vm0, %v267_v21 }
  0xc9   : > { %545 = vmatmul.mubr.msk.f32.vlgmr.msra.gmra.mrb[0].mxu0 %vm273_vm1, %v268_v24  ;;  %548 = vmatmul.mubr.msk.f32.vlgmr.msra.gmra.mrb[0].mxu1 %vm273_vm1, %v268_v24 }
 0x19c   : > { %v352_v25 = vpop.f32.mrb[0].mxu0  ;;  %v423_v26 = vpop.f32.mrb[0].mxu1 }
 0x19d   : > { %428 = vst [vmem:[%s231_s6] sm:$0xff] %v352_v25  ;;  %430 = vst [vmem:[%s231_s6 + $0x10] sm:$0xff] %v423_v26  ;;  %v354_v27 = vpop.f32.mrb[1].mxu0  ;;  %v425_v28 = vpop.f32.mrb[1].mxu1 }
 0x19e   : > { %429 = vst [vmem:[%s231_s6 + $0x8] sm:$0xff] %v354_v27  ;;  %431 = vst [vmem:[%s231_s6 + $0x18] sm:$0xff] %v425_v28 }
 0x19f   : > { %665 = shalt.err (!%p662_p6)
}
 0x1a0   : > { %s666_s11 = scalar_lea.hbm %s901_s21, 512  ;;  %s670_s27 = scalar_lea.hbm %s952_s4, 1024 }
 0x1a1   : > { %p667_p4 = scmp.ne.s32.totalorder %s901_s21, %s666_s11  ;;  %p671_p1 = scmp.lt.u32.totalorder %s901_s21, %s952_s4 }
 0x1a2   : > { %p672_p2 = scmp.lt.u32.totalorder %s670_s27, %s666_s11  ;;  %p674_p8 = scmp.lt.u32.totalorder %s666_s11, %s901_s21 }
 0x1a3   : > { %p668_p10 = pnand %p667_p4, %p961_p9 }
 0x1a4   : > { %p673_p5 = por %p672_p2, %p671_p1 }
 0x1a5   : > { %p669_p12 = pneg %p668_p10 }
 0x1a6   : > { %p675_p11 = por %p674_p8, %p673_p5 }
 0x1a8   : > { %p676_p0 = pnand %p675_p11, %p669_p12 }
 0x1aa   : > { %679 = shalt.err (!%p676_p0)
}
 0x1ab   : > { %558 = dma.vmem_to_hbm [thread:$0]  (%p961_p9), %s896_s5, 512, %s901_s21, %s433_s22  }
 0x1ac PF: > { %s461_s6 = sand.u32 1, %s714_s15   ;;  %p962_p7 = scmp.ne.s32.totalorder %s957_s30, 0 }
 0x1ad   : > { %p963_p13 = scmp.ge.s32.totalorder %s734_s20, 2  ;;  %s462_s7 = scalar_lea.sflag [#allocation4], %s461_s6 }
 0x1af   : > { %p565_p3 = pnand %p963_p13, %p962_p7 }
 0x1b1   : > { %709 = dma.done.wait (!%p565_p3), %s462_s7, 512  }
 0x1b2   : > { %711 = vsyncadd (!%p565_p3), %s462_s7, 4294966784  ;;  %s20_s20 = sadd.s32 1, %s734_s20   ;;  %s964_s15 = smov %s718_s16 }
 0x1b3   : > { %p17_p6 = scmp.ge.s32.totalorder %s20_s20, 4   ;;  %s965_s16 = smov %s722_s17 }
 0x1b4   : > { %s966_s17 = smov %s822_s29  ;;  %s967_s18 = smov %s730_s19 }
 0x1b5   : > { %s968_s19 = smov %s970_s23  ;;  %19 = sbr.rel (!%p17_p6) target bundleno = 6 (0x6), region = 81 }
 0x1bc   :  { %467 = vsyncpa [#allocation3], 1 }
 0x1bd   :  { %469 = vsyncpa [#allocation3 + $0x1], 1 }
 0x1be   :  { %470 = vsyncpa [#allocation4], 1 }
 0x1bf   :  { %472 = vsyncpa [#allocation4 + $0x1], 1 }

</bundles_post_ra>
